<compile_context>
chip_gen: v6e
topology: v6e:2x2x1
jax: 0.10.0
libtpu: 0.0.40
codegen_flags: <defaults>
</compile_context>

<pallas_src>
import functools

import jax
import jax.numpy as jnp
from jax.experimental import pallas as pl
from jax.experimental.pallas import tpu as pltpu

EPS = 1e-5
COMPUTE_DTYPE = jnp.bfloat16     # MXU-native; accumulation is f32 in-kernel.


# ----------------------------------------------------------------------------
# Fused Pallas kernel: branch2a -> branch2b -> (+ 1x1 shortcut) -> add -> ReLU
# ----------------------------------------------------------------------------
def _fused_block_kernel(x_ref, a_ref, b_ref, s_ref, b2a_ref, b2b_ref, bs_ref,
                        o_ref, *, H):
    """One batch image per grid step.

    x_ref  : (1, H, W*Cin)        bf16  lane-dense input rows
    a_ref  : (3, W*Cin,  W*Cout)  bf16  branch2a banded weights (one per ky)
    b_ref  : (3, W*Cout, W*Cout)  bf16  branch2b banded weights (one per ky)
    s_ref  : (W*Cin, W*Cout)      bf16  1x1 shortcut block-diagonal weights
    b2a/b2b/bs_ref : (1, W*Cout)  f32   BN-folded biases, tiled over W
    o_ref  : (1, H, W*Cout)       f32   output rows (single lane-dense store)
    """
    f32 = jnp.float32
    x = x_ref[0]                                     # (H, W*Cin)
    wc_out = a_ref.shape[-1]

    # Row-index masks zero out the rows that wrap around in the rolls below
    # (they correspond to the zero padding above / below the image).
    row = jax.lax.broadcasted_iota(jnp.int32, (H, wc_out), 0)
    top = row == 0
    bot = row == H - 1
    zeros = jnp.zeros((H, wc_out), f32)

    def conv3x3(lhs, w3_ref, bias_ref):
        # out[h] = x[h-1] @ W_ky0 + x[h] @ W_ky1 + x[h+1] @ W_ky2 (+ bias);
        # the W boundary is already baked into the banded W_ky matrices.
        mid = jnp.dot(lhs, w3_ref[1], preferred_element_type=f32)
        up = jnp.dot(lhs, w3_ref[0], preferred_element_type=f32)   # from row h-1
        dn = jnp.dot(lhs, w3_ref[2], preferred_element_type=f32)   # from row h+1
        acc = mid
        acc = acc + jnp.where(top, zeros, pltpu.roll(up, shift=1, axis=0))
        acc = acc + jnp.where(bot, zeros, pltpu.roll(dn, shift=H - 1, axis=0))
        return acc + bias_ref[...]                   # (1, W*Cout) broadcasts

    y2a = jnp.maximum(conv3x3(x, a_ref, b2a_ref), 0.0)          # branch2a + ReLU
    y2b = conv3x3(y2a.astype(x.dtype), b_ref, b2b_ref)          # branch2b
    short = jnp.dot(x, s_ref[...], preferred_element_type=f32) + bs_ref[...]
    o_ref[0] = jnp.maximum(y2b + short, 0.0).astype(o_ref.dtype)  # add + ReLU


def _fused_block_call(x_ld, band_a, band_b, s_mat, b2a_t, b2b_t, bs_t, *,
                      out_dtype):
    N, H, wc_in = x_ld.shape
    wc_out = band_a.shape[-1]
    kernel = functools.partial(_fused_block_kernel, H=H)
    return pl.pallas_call(
        kernel,
        out_shape=jax.ShapeDtypeStruct((N, H, wc_out), out_dtype),
        grid=(N,),
        in_specs=[
            pl.BlockSpec((1, H, wc_in), lambda n: (n, 0, 0)),
            pl.BlockSpec((3, wc_in, wc_out), lambda n: (0, 0, 0)),
            pl.BlockSpec((3, wc_out, wc_out), lambda n: (0, 0, 0)),
            pl.BlockSpec((wc_in, wc_out), lambda n: (0, 0)),
            pl.BlockSpec((1, wc_out), lambda n: (0, 0)),
            pl.BlockSpec((1, wc_out), lambda n: (0, 0)),
            pl.BlockSpec((1, wc_out), lambda n: (0, 0)),
        ],
        out_specs=pl.BlockSpec((1, H, wc_out), lambda n: (n, 0, 0)),
        compiler_params=pltpu.CompilerParams(
            dimension_semantics=("parallel",)),    # batch -> both TCs on v7x
    )(x_ld, band_a, band_b, s_mat, b2a_t, b2b_t, bs_t)


# ----------------------------------------------------------------------------
# Weight preparation: BN folding + banded / block-diagonal matrices
# ----------------------------------------------------------------------------
def _fold_bn(w_hwio, gamma, beta, mean, var):
    """Fold eval-mode BatchNorm into conv weight (HWIO) + bias."""
    scale = gamma / jnp.sqrt(var + EPS)                      # (Cout,)
    return (w_hwio * scale).astype(jnp.float32), (beta - mean * scale).astype(jnp.float32)


def _band_3x3(w_hwio, W, dtype):
    """(3,3,Cin,Cout) conv weights -> (3, W*Cin, W*Cout) block-tridiagonal mats.

    mats[ky][w_in*Cin+ci, w_out*Cout+co] = w[ky, kx, ci, co] with
    kx = w_in - w_out + 1 (zero outside 0..2), which bakes the 'same' zero
    padding along W into the matrix.
    """
    _, _, Cin, Cout = w_hwio.shape
    mats = []
    for ky in range(3):
        m = jnp.zeros((W, Cin, W, Cout), jnp.float32)
        for kx in range(3):
            ind = jnp.eye(W, k=1 - kx, dtype=jnp.float32)    # [w_in, w_out]
            m = m + ind[:, None, :, None] * w_hwio[ky, kx][None, :, None, :]
        mats.append(m.reshape(W * Cin, W * Cout))
    return jnp.stack(mats, axis=0).astype(dtype)


def _block_diag_1x1(w_io, W, dtype):
    """(Cin,Cout) 1x1 conv weights -> (W*Cin, W*Cout) block-diagonal matrix."""
    m = jnp.eye(W, dtype=jnp.float32)[:, None, :, None] * w_io[None, :, None, :]
    return m.reshape(W * w_io.shape[0], W * w_io.shape[1]).astype(dtype)


def make_params(key, ch_in, ch_out):
    ks = jax.random.split(key, 6)

    def conv_w(k, kh, kw, cin, cout):
        # torch layout (cout, cin, kh, kw) -> HWIO
        w = 0.1 * jax.random.normal(k, (cout, cin, kh, kw), jnp.float32)
        return jnp.transpose(w, (2, 3, 1, 0))

    def bn(k, c):
        k1, k2, k3, k4 = jax.random.split(k, 4)
        gamma = 1.0 + 0.1 * jax.random.normal(k1, (c,), jnp.float32)
        beta = 0.1 * jax.random.normal(k2, (c,), jnp.float32)
        mean = 0.1 * jax.random.normal(k3, (c,), jnp.float32)
        var = jnp.abs(jax.random.normal(k4, (c,), jnp.float32)) + 0.5
        return gamma, beta, mean, var

    p = {}
    # branch2a: 3x3, ch_in -> ch_out, stride 1, relu
    p["w2a"], p["b2a"] = _fold_bn(conv_w(ks[0], 3, 3, ch_in, ch_out), *bn(ks[1], ch_out))
    # branch2b: 3x3, ch_out -> ch_out, stride 1, no act
    p["w2b"], p["b2b"] = _fold_bn(conv_w(ks[2], 3, 3, ch_out, ch_out), *bn(ks[3], ch_out))
    # short: 1x1, ch_in -> ch_out, stride 1
    w1f, b1f = _fold_bn(conv_w(ks[4], 1, 1, ch_in, ch_out), *bn(ks[5], ch_out))
    p["ws"], p["bs"] = w1f.reshape(ch_in, ch_out), b1f
    return p


# ----------------------------------------------------------------------------
# Public forward (NCHW in / NCHW out, matching the PyTorch module)
# ----------------------------------------------------------------------------
def basic_block_forward(x_nchw, params):
    N, Cin, H, W = x_nchw.shape
    Cout = params["b2a"].shape[0]
    cdt = COMPUTE_DTYPE

    # Layout plumbing: NCHW -> lane-dense (N, H, W*Cin); cast first so the
    # boundary transpose moves half the bytes.  (In a full backbone keep the
    # activations in this layout end-to-end and these transposes disappear.)
    x_ld = jnp.transpose(x_nchw.astype(cdt), (0, 2, 3, 1)).reshape(N, H, W * Cin)

    band_a = _band_3x3(params["w2a"], W, cdt)        # (3, W*Cin,  W*Cout)
    band_b = _band_3x3(params["w2b"], W, cdt)        # (3, W*Cout, W*Cout)
    s_mat = _block_diag_1x1(params["ws"], W, cdt)    # (W*Cin, W*Cout)
    b2a_t = jnp.tile(params["b2a"], W).reshape(1, W * Cout)
    b2b_t = jnp.tile(params["b2b"], W).reshape(1, W * Cout)
    bs_t = jnp.tile(params["bs"], W).reshape(1, W * Cout)

    out_ld = _fused_block_call(x_ld, band_a, band_b, s_mat, b2a_t, b2b_t, bs_t,
                               out_dtype=jnp.float32)
    out = out_ld.reshape(N, H, W, Cout)
    return jnp.transpose(out, (0, 3, 1, 2))          # NHWC -> NCHW


# ----------------------------------------------------------------------------
# Pure-JAX reference (same bf16 quantization, f32 accumulation)
# ----------------------------------------------------------------------------
def _ref_forward(x_nchw, params):
    cdt = COMPUTE_DTYPE
    x = jnp.transpose(x_nchw, (0, 2, 3, 1)).astype(cdt)
    dn = ("NHWC", "HWIO", "NHWC")

    def conv3(h, w, b):
        y = jax.lax.conv_general_dilated(
            h, w.astype(cdt), (1, 1), "SAME", dimension_numbers=dn,
            preferred_element_type=jnp.float32)
        return y + b

    y2a = jax.nn.relu(conv3(x, params["w2a"], params["b2a"])).astype(cdt)
    y2b = conv3(y2a, params["w2b"], params["b2b"])
    short = jnp.einsum("nhwc,cd->nhwd", x, params["ws"].astype(cdt),
                       preferred_element_type=jnp.float32) + params["bs"]
    out = jax.nn.relu(y2b + short)
    return jnp.transpose(out, (0, 3, 1, 2))


if __name__ == "__main__":
    key = jax.random.PRNGKey(0)
    kx, kp = jax.random.split(key)

    N, C_IN, C_OUT, H, W = 2, 8, 16, 16, 16
    x = jax.random.normal(kx, (N, C_IN, H, W), jnp.float32)     # NCHW like PyTorch
    params = make_params(kp, C_IN, C_OUT)

    fwd = jax.jit(basic_block_forward)
    out = jax.block_until_ready(fwd(x, params))
    assert out.shape == (N, C_OUT, H, W), out.shape

    ref = jax.block_until_ready(_ref_forward(x, params))
    max_err = float(jnp.max(jnp.abs(out - ref)))
    # Both paths use identical bf16 inputs/weights with f32 accumulation; the
    # residual difference is summation order plus rare 1-ulp bf16 re-rounding
    # of the branch2a intermediate, so 1e-2 absolute is a safe, tight bound.
    if max_err > 1e-2:
        raise AssertionError(f"mismatch vs reference: {max_err}")

    print("KERNEL_OK")
</pallas_src>

<mosaic_0001>
module attributes {stable_mosaic.version = 11 : i64} {
  func.func @_fused_block_kernel(%arg0: i32, %arg1: memref<1x16x128xbf16, #tpu.memory_space<vmem>>, %arg2: memref<3x128x256xbf16, #tpu.memory_space<vmem>>, %arg3: memref<3x256x256xbf16, #tpu.memory_space<vmem>>, %arg4: memref<128x256xbf16, #tpu.memory_space<vmem>>, %arg5: memref<1x256xf32, #tpu.memory_space<vmem>>, %arg6: memref<1x256xf32, #tpu.memory_space<vmem>>, %arg7: memref<1x256xf32, #tpu.memory_space<vmem>>, %arg8: memref<1x16x256xf32, #tpu.memory_space<vmem>>) attributes {dimension_semantics = [#tpu.dimension_semantics<parallel>], iteration_bounds = array<i64: 2>, scalar_prefetch = 0 : i64, scratch_operands = 0 : i64, tpu.core_type = #tpu.core_type<tc>, window_params = [{transform_indices = @transform_0, window_bounds = array<i64: 1, 16, 128>}, {pipeline_mode = #tpu.pipeline_mode<synchronous>, transform_indices = @transform_1, window_bounds = array<i64: 3, 128, 256>}, {pipeline_mode = #tpu.pipeline_mode<synchronous>, transform_indices = @transform_2, window_bounds = array<i64: 3, 256, 256>}, {pipeline_mode = #tpu.pipeline_mode<synchronous>, transform_indices = @transform_3, window_bounds = array<i64: 128, 256>}, {pipeline_mode = #tpu.pipeline_mode<synchronous>, transform_indices = @transform_4, window_bounds = array<i64: 1, 256>}, {pipeline_mode = #tpu.pipeline_mode<synchronous>, transform_indices = @transform_5, window_bounds = array<i64: 1, 256>}, {pipeline_mode = #tpu.pipeline_mode<synchronous>, transform_indices = @transform_6, window_bounds = array<i64: 1, 256>}, {transform_indices = @transform_7, window_bounds = array<i64: 1, 16, 256>}]} {
    %c0 = arith.constant 0 : index
    %c0_0 = arith.constant 0 : index
    %c0_1 = arith.constant 0 : index
    %0 = vector.load %arg1[%c0, %c0_0, %c0_1] : memref<1x16x128xbf16, #tpu.memory_space<vmem>>, vector<1x16x128xbf16>
    %1 = vector.shape_cast %0 : vector<1x16x128xbf16> to vector<16x128xbf16>
    %2 = tpu.iota {dimensions = array<i32: 0>} : vector<16x256xi32>
    %c0_i32 = arith.constant 0 : i32
    %3 = vector.broadcast %c0_i32 : i32 to vector<16x256xi32>
    %4 = arith.cmpi eq, %2, %3 : vector<16x256xi32>
    %c15_i32 = arith.constant 15 : i32
    %5 = vector.broadcast %c15_i32 : i32 to vector<16x256xi32>
    %6 = arith.cmpi eq, %2, %5 : vector<16x256xi32>
    %cst = arith.constant 0.000000e+00 : f32
    %7 = vector.broadcast %cst : f32 to vector<16x256xf32>
    %c1 = arith.constant 1 : index
    %c0_2 = arith.constant 0 : index
    %c0_3 = arith.constant 0 : index
    %8 = vector.load %arg2[%c1, %c0_2, %c0_3] : memref<3x128x256xbf16, #tpu.memory_space<vmem>>, vector<1x128x256xbf16>
    %9 = vector.shape_cast %8 : vector<1x128x256xbf16> to vector<128x256xbf16>
    %cst_4 = arith.constant dense<0.000000e+00> : vector<16x256xf32>
    %10 = tpu.matmul %1, %9, %cst_4 {dimension_numbers = #tpu.dot_dimension_numbers<[1], [0], [0], [1], [0, 0, 1, 1], [], []>} : vector<16x128xbf16>, vector<128x256xbf16>, vector<16x256xf32> -> vector<16x256xf32>
    %c0_5 = arith.constant 0 : index
    %c0_6 = arith.constant 0 : index
    %c0_7 = arith.constant 0 : index
    %11 = vector.load %arg2[%c0_5, %c0_6, %c0_7] : memref<3x128x256xbf16, #tpu.memory_space<vmem>>, vector<1x128x256xbf16>
    %12 = vector.shape_cast %11 : vector<1x128x256xbf16> to vector<128x256xbf16>
    %cst_8 = arith.constant dense<0.000000e+00> : vector<16x256xf32>
    %13 = tpu.matmul %1, %12, %cst_8 {dimension_numbers = #tpu.dot_dimension_numbers<[1], [0], [0], [1], [0, 0, 1, 1], [], []>} : vector<16x128xbf16>, vector<128x256xbf16>, vector<16x256xf32> -> vector<16x256xf32>
    %c2 = arith.constant 2 : index
    %c0_9 = arith.constant 0 : index
    %c0_10 = arith.constant 0 : index
    %14 = vector.load %arg2[%c2, %c0_9, %c0_10] : memref<3x128x256xbf16, #tpu.memory_space<vmem>>, vector<1x128x256xbf16>
    %15 = vector.shape_cast %14 : vector<1x128x256xbf16> to vector<128x256xbf16>
    %cst_11 = arith.constant dense<0.000000e+00> : vector<16x256xf32>
    %16 = tpu.matmul %1, %15, %cst_11 {dimension_numbers = #tpu.dot_dimension_numbers<[1], [0], [0], [1], [0, 0, 1, 1], [], []>} : vector<16x128xbf16>, vector<128x256xbf16>, vector<16x256xf32> -> vector<16x256xf32>
    %c1_i32 = arith.constant 1 : i32
    %17 = tpu.dynamic_rotate %13 by %c1_i32 dim 0 : vector<16x256xf32>, i32 -> vector<16x256xf32>
    %18 = arith.select %4, %7, %17 : vector<16x256xi1>, vector<16x256xf32>
    %19 = arith.addf %10, %18 : vector<16x256xf32>
    %c15_i32_12 = arith.constant 15 : i32
    %20 = tpu.dynamic_rotate %16 by %c15_i32_12 dim 0 : vector<16x256xf32>, i32 -> vector<16x256xf32>
    %21 = arith.select %6, %7, %20 : vector<16x256xi1>, vector<16x256xf32>
    %22 = arith.addf %19, %21 : vector<16x256xf32>
    %c0_13 = arith.constant 0 : index
    %c0_14 = arith.constant 0 : index
    %23 = vector.load %arg5[%c0_13, %c0_14] : memref<1x256xf32, #tpu.memory_space<vmem>>, vector<1x256xf32>
    %24 = vector.broadcast %23 : vector<1x256xf32> to vector<16x256xf32>
    %25 = arith.addf %22, %24 : vector<16x256xf32>
    %cst_15 = arith.constant 0.000000e+00 : f32
    %26 = vector.broadcast %cst_15 : f32 to vector<16x256xf32>
    %27 = arith.maximumf %25, %26 : vector<16x256xf32>
    %28 = arith.truncf %27 : vector<16x256xf32> to vector<16x256xbf16>
    %c1_16 = arith.constant 1 : index
    %c0_17 = arith.constant 0 : index
    %c0_18 = arith.constant 0 : index
    %29 = vector.load %arg3[%c1_16, %c0_17, %c0_18] : memref<3x256x256xbf16, #tpu.memory_space<vmem>>, vector<1x256x256xbf16>
    %30 = vector.shape_cast %29 : vector<1x256x256xbf16> to vector<256x256xbf16>
    %cst_19 = arith.constant dense<0.000000e+00> : vector<16x256xf32>
    %31 = tpu.matmul %28, %30, %cst_19 {dimension_numbers = #tpu.dot_dimension_numbers<[1], [0], [0], [1], [0, 0, 1, 1], [], []>} : vector<16x256xbf16>, vector<256x256xbf16>, vector<16x256xf32> -> vector<16x256xf32>
    %c0_20 = arith.constant 0 : index
    %c0_21 = arith.constant 0 : index
    %c0_22 = arith.constant 0 : index
    %32 = vector.load %arg3[%c0_20, %c0_21, %c0_22] : memref<3x256x256xbf16, #tpu.memory_space<vmem>>, vector<1x256x256xbf16>
    %33 = vector.shape_cast %32 : vector<1x256x256xbf16> to vector<256x256xbf16>
    %cst_23 = arith.constant dense<0.000000e+00> : vector<16x256xf32>
    %34 = tpu.matmul %28, %33, %cst_23 {dimension_numbers = #tpu.dot_dimension_numbers<[1], [0], [0], [1], [0, 0, 1, 1], [], []>} : vector<16x256xbf16>, vector<256x256xbf16>, vector<16x256xf32> -> vector<16x256xf32>
    %c2_24 = arith.constant 2 : index
    %c0_25 = arith.constant 0 : index
    %c0_26 = arith.constant 0 : index
    %35 = vector.load %arg3[%c2_24, %c0_25, %c0_26] : memref<3x256x256xbf16, #tpu.memory_space<vmem>>, vector<1x256x256xbf16>
    %36 = vector.shape_cast %35 : vector<1x256x256xbf16> to vector<256x256xbf16>
    %cst_27 = arith.constant dense<0.000000e+00> : vector<16x256xf32>
    %37 = tpu.matmul %28, %36, %cst_27 {dimension_numbers = #tpu.dot_dimension_numbers<[1], [0], [0], [1], [0, 0, 1, 1], [], []>} : vector<16x256xbf16>, vector<256x256xbf16>, vector<16x256xf32> -> vector<16x256xf32>
    %c1_i32_28 = arith.constant 1 : i32
    %38 = tpu.dynamic_rotate %34 by %c1_i32_28 dim 0 : vector<16x256xf32>, i32 -> vector<16x256xf32>
    %39 = arith.select %4, %7, %38 : vector<16x256xi1>, vector<16x256xf32>
    %40 = arith.addf %31, %39 : vector<16x256xf32>
    %c15_i32_29 = arith.constant 15 : i32
    %41 = tpu.dynamic_rotate %37 by %c15_i32_29 dim 0 : vector<16x256xf32>, i32 -> vector<16x256xf32>
    %42 = arith.select %6, %7, %41 : vector<16x256xi1>, vector<16x256xf32>
    %43 = arith.addf %40, %42 : vector<16x256xf32>
    %c0_30 = arith.constant 0 : index
    %c0_31 = arith.constant 0 : index
    %44 = vector.load %arg6[%c0_30, %c0_31] : memref<1x256xf32, #tpu.memory_space<vmem>>, vector<1x256xf32>
    %45 = vector.broadcast %44 : vector<1x256xf32> to vector<16x256xf32>
    %46 = arith.addf %43, %45 : vector<16x256xf32>
    %c0_32 = arith.constant 0 : index
    %c0_33 = arith.constant 0 : index
    %47 = vector.load %arg4[%c0_32, %c0_33] : memref<128x256xbf16, #tpu.memory_space<vmem>>, vector<128x256xbf16>
    %cst_34 = arith.constant dense<0.000000e+00> : vector<16x256xf32>
    %48 = tpu.matmul %1, %47, %cst_34 {dimension_numbers = #tpu.dot_dimension_numbers<[1], [0], [0], [1], [0, 0, 1, 1], [], []>} : vector<16x128xbf16>, vector<128x256xbf16>, vector<16x256xf32> -> vector<16x256xf32>
    %c0_35 = arith.constant 0 : index
    %c0_36 = arith.constant 0 : index
    %49 = vector.load %arg7[%c0_35, %c0_36] : memref<1x256xf32, #tpu.memory_space<vmem>>, vector<1x256xf32>
    %50 = vector.broadcast %49 : vector<1x256xf32> to vector<16x256xf32>
    %51 = arith.addf %48, %50 : vector<16x256xf32>
    %52 = arith.addf %46, %51 : vector<16x256xf32>
    %cst_37 = arith.constant 0.000000e+00 : f32
    %53 = vector.broadcast %cst_37 : f32 to vector<16x256xf32>
    %54 = arith.maximumf %52, %53 : vector<16x256xf32>
    %c0_38 = arith.constant 0 : index
    %c0_39 = arith.constant 0 : index
    %c0_40 = arith.constant 0 : index
    %55 = vector.load %arg8[%c0_38, %c0_39, %c0_40] : memref<1x16x256xf32, #tpu.memory_space<vmem>>, vector<1x16x256xf32>
    %56 = vector.shape_cast %55 : vector<1x16x256xf32> to vector<16x256xf32>
    %57 = vector.shape_cast %54 : vector<16x256xf32> to vector<1x16x256xf32>
    tpu.vector_store %arg8[%c0_38, %c0_39, %c0_40], %57 {strides = array<i32>} : memref<1x16x256xf32, #tpu.memory_space<vmem>>, vector<1x16x256xf32>,
    return
  }
  func.func @transform_0(%arg0: i32) -> (i32, i32, i32) {
    %c0_i32 = arith.constant 0 : i32
    %c0_i32_0 = arith.constant 0 : i32
    %c0_i32_1 = arith.constant 0 : i32
    return %arg0, %c0_i32, %c0_i32_0 : i32, i32, i32
  }
  func.func @transform_1(%arg0: i32) -> (i32, i32, i32) {
    %c0_i32 = arith.constant 0 : i32
    %c0_i32_0 = arith.constant 0 : i32
    %c0_i32_1 = arith.constant 0 : i32
    %c0_i32_2 = arith.constant 0 : i32
    return %c0_i32, %c0_i32_0, %c0_i32_1 : i32, i32, i32
  }
  func.func @transform_2(%arg0: i32) -> (i32, i32, i32) {
    %c0_i32 = arith.constant 0 : i32
    %c0_i32_0 = arith.constant 0 : i32
    %c0_i32_1 = arith.constant 0 : i32
    %c0_i32_2 = arith.constant 0 : i32
    return %c0_i32, %c0_i32_0, %c0_i32_1 : i32, i32, i32
  }
  func.func @transform_3(%arg0: i32) -> (i32, i32) {
    %c0_i32 = arith.constant 0 : i32
    %c0_i32_0 = arith.constant 0 : i32
    %c0_i32_1 = arith.constant 0 : i32
    return %c0_i32, %c0_i32_0 : i32, i32
  }
  func.func @transform_4(%arg0: i32) -> (i32, i32) {
    %c0_i32 = arith.constant 0 : i32
    %c0_i32_0 = arith.constant 0 : i32
    %c0_i32_1 = arith.constant 0 : i32
    return %c0_i32, %c0_i32_0 : i32, i32
  }
  func.func @transform_5(%arg0: i32) -> (i32, i32) {
    %c0_i32 = arith.constant 0 : i32
    %c0_i32_0 = arith.constant 0 : i32
    %c0_i32_1 = arith.constant 0 : i32
    return %c0_i32, %c0_i32_0 : i32, i32
  }
  func.func @transform_6(%arg0: i32) -> (i32, i32) {
    %c0_i32 = arith.constant 0 : i32
    %c0_i32_0 = arith.constant 0 : i32
    %c0_i32_1 = arith.constant 0 : i32
    return %c0_i32, %c0_i32_0 : i32, i32
  }
  func.func @transform_7(%arg0: i32) -> (i32, i32, i32) {
    %c0_i32 = arith.constant 0 : i32
    %c0_i32_0 = arith.constant 0 : i32
    %c0_i32_1 = arith.constant 0 : i32
    return %arg0, %c0_i32, %c0_i32_0 : i32, i32, i32
  }
}

</mosaic_0001>

<bundles_post_ra>
// kernel: tile.18
= control target key start
LH: loop header
LB: loop body
LE: loop exit
PB: predicated region body
PF: predicated region fallthrough
CT: control target
= control target key end

     0   :  { %s28_s0 = inlined_call_operand.vmem [shape: f32[16], index: 0, kind: input, shape index: {}]   ;;  %s29_s1 = inlined_call_operand.vmem [shape: f32[16,16], index: 1, kind: output, shape index: {}]  }
   0x1   :  { %v4_v0 = vld [vmem:[%s28_s0] ss:$0 sm:$0xff] }
   0x2   :  { %5 = vst [vmem:[%s29_s1] sm:$0xff] %v4_v0  ;;  %8 = vst [vmem:[%s29_s1 + $0x8] sm:$0xff] %v4_v0 }

// kernel: tile.19
= control target key start
LH: loop header
LB: loop body
LE: loop exit
PB: predicated region body
PF: predicated region fallthrough
CT: control target
= control target key end

     0   :  { %s7_s6 = smov 3  ;;  %s21_s9 = smov 3  ;;  %vm4_vm0 = vcmask 130048   ;;  %vm11_vm1 = vcmask 1048448   ;;  %vm18_vm2 = vcmask 917248   ;;  %vm25_vm3 = vcmask 786048   ;;  %s131_s0 = inlined_call_operand.vmem [shape: f32[16,16], index: 0, kind: input, shape index: {}]   ;;  %s132_s1 = inlined_call_operand.vmem [shape: f32[1,256], index: 1, kind: output, shape index: {}]  }
   0x1   :  { %v69_v0 = vld [vmem:[%s131_s0 + $0x7] ss:$8 sm:%s7_s6]   ;;  %s84_s10 = smov 112   ;;  %v71_v1 = vld [vmem:[%s131_s0 + $0x5] ss:$8 sm:%s21_s9]   ;;  %s14_s13 = smov 3 }
   0x2   :  { %9 = vrot.lane.b32.xlu0 %v69_v0, %s84_s10  ;;  %s85_s14 = smov 80   ;;  %v70_v2 = vld [vmem:[%s131_s0 + $0x6] ss:$8 sm:%s14_s13]   ;;  %s28_s17 = smov 3  ;;  %vm32_vm4 = vcmask 654848   ;;  %vm39_vm5 = vcmask 523648  }
   0x3   :  { %23 = vrot.lane.b32.xlu1 %v71_v1, %s85_s14  ;;  %v72_v3 = vld [vmem:[%s131_s0 + $0x4] ss:$8 sm:%s28_s17]   ;;  %s35_s20 = smov 3  ;;  %s42_s21 = smov 3  ;;  %vm46_vm6 = vcmask 392448   ;;  %vm53_vm7 = vcmask 261248  }
   0x4   :  { %s86_s22 = smov 96   ;;  %s87_s23 = smov 64   ;;  %v73_v4 = vld [vmem:[%s131_s0 + $0x3] ss:$8 sm:%s35_s20]   ;;  %v74_v5 = vld [vmem:[%s131_s0 + $0x2] ss:$8 sm:%s42_s21]  }
   0x5   :  { %s2_s26 = smov 3  ;;  %s49_s29 = smov 3 }
   0x6   :  { %16 = vrot.lane.b32.xlu0 %v70_v2, %s86_s22  ;;  %v3_v6 = vld [vmem:[%s131_s0] ss:$8 sm:%s2_s26]   ;;  %s88_s3 = smov 48   ;;  %s89_s4 = smov 32  }
   0x7   :  { %30 = vrot.lane.b32.xlu1 %v72_v3, %s87_s23  ;;  %5 = vst.msk [vmem:[#allocation0] ss:$8 sm:$0x3] %vm4_vm0, %v3_v6   ;;  %v75_v7 = vld [vmem:[%s131_s0 + $0x1] ss:$8 sm:%s49_s29]   ;;  %s90_s0 = smov 16  }
   0xa   :  { %37 = vrot.lane.b32.xlu0 %v73_v4, %s88_s3 }
   0xb   :  { %44 = vrot.lane.b32.xlu1 %v74_v5, %s89_s4 }
   0xe   :  { %51 = vrot.lane.b32.xlu0 %v75_v7, %s90_s0 }
  0x74   :  { %v10_v8 = vpop.permute.xlu0 %9  }
  0x75   :  { %12 = vst.msk [vmem:[#allocation0] ss:$8 sm:$0x3] %vm11_vm1, %v10_v8   ;;  %v24_v9 = vpop.permute.xlu1 %23  }
  0x78   :  { %v17_v10 = vpop.permute.xlu0 %16  }
  0x79   :  { %19 = vst.msk [vmem:[#allocation0] ss:$8 sm:$0x3] %vm18_vm2, %v17_v10   ;;  %v31_v11 = vpop.permute.xlu1 %30  }
  0x7a   :  { %26 = vst.msk [vmem:[#allocation0] ss:$8 sm:$0x3] %vm25_vm3, %v24_v9  }
  0x7b   :  { %33 = vst.msk [vmem:[#allocation0] ss:$8 sm:$0x3] %vm32_vm4, %v31_v11  }
  0x7c   :  { %v38_v12 = vpop.permute.xlu0 %37  }
  0x7d   :  { %40 = vst.msk [vmem:[#allocation0] ss:$8 sm:$0x3] %vm39_vm5, %v38_v12   ;;  %v45_v13 = vpop.permute.xlu1 %44  }
  0x7e   :  { %47 = vst.msk [vmem:[#allocation0] ss:$8 sm:$0x3] %vm46_vm6, %v45_v13  }
  0x80   :  { %v52_v14 = vpop.permute.xlu0 %51  }
  0x81   :  { %54 = vst.msk [vmem:[#allocation0] ss:$8 sm:$0x3] %vm53_vm7, %v52_v14  }
  0x88   :  { %v59_v15 = vld [vmem:[#allocation0] sm:$0x1]  ;;  %v64_v16 = vld [vmem:[#allocation0 + $0x8] sm:$0x1] }
  0x89   :  { %62 = vst [vmem:[%s132_s1] sm:$0x1] %v59_v15  ;;  %76 = vst [vmem:[%s132_s1 + $0x1] sm:$0x1] %v64_v16 }

// kernel: basic_block_forward.1
= control target key start
LH: loop header
LB: loop body
LE: loop exit
PB: predicated region body
PF: predicated region fallthrough
CT: control target
= control target key end

     0   :  { %s2304_s24 = smov 0   ;;  %s2901_s0 = inlined_call_operand.vmem [shape: bf16[2,16,128], index: 0, kind: input, shape index: {}]   ;;  %s2902_s1 = inlined_call_operand.vmem [shape: bf16[3,128,256], index: 1, kind: input, shape index: {}]   ;;  %s2903_s2 = inlined_call_operand.vmem [shape: bf16[3,256,256], index: 2, kind: input, shape index: {}]   ;;  %s2904_s3 = inlined_call_operand.vmem [shape: bf16[128,256], index: 3, kind: input, shape index: {}]   ;;  %s2905_s4 = inlined_call_operand.vmem [shape: f32[1,256], index: 4, kind: input, shape index: {}]   ;;  %s2906_s5 = inlined_call_operand.vmem [shape: f32[1,256], index: 5, kind: input, shape index: {}]   ;;  %s2907_s6 = inlined_call_operand.vmem [shape: f32[1,256], index: 6, kind: input, shape index: {}]   ;;  %s2908_s7 = inlined_call_operand.vmem [shape: f32[2,16,256], index: 7, kind: output, shape index: {}]  }
   0x1 LB: > { %s1735_s25 = sadd.s32 4294967295, %s2261_s24   ;;  %p1739_p0 = scmp.ge.s32.totalorder %s2261_s24, 1  ;;  %s2261_s24 = sphi %s2304_s24, %s17_s24  }
   0x2   : > { %p237_p1 = scmp.lt.s32.totalorder %s2261_s24, 3 }
   0x4   : > { %p238_p2 = pnand %p1739_p0, %p237_p1 }
   0x5   : > { %p269_p3 = scmp.lt.s32.totalorder (!%p238_p2), %s1735_s25, 1 }
   0x6   : > { %241 = sbr.rel (%p238_p2) target bundleno = 561 (0x231), region = 48 }
   0xb   : > { %v2014_v0 = vld [vmem:[%s2902_s1 + $0x74] ss:$8 sps:$4 sm:$0xff]   ;;  %v2016_v1 = vld [vmem:[%s2902_s1 + $0x70] ss:$8 sps:$4 sm:$0xff]   ;;  %v2263_v2 = vmov 0   ;;  %s2910_s25 = smov (!%p269_p3, %s1735_s25), 1 }
   0xc   : > { %440 = vmatprep.mubr.bf16.mxu0 %v2263_v2  ;;  %580 = vmatprep.mubr.bf16.mxu1 %v2263_v2  ;;  %v2017_v3 = vld [vmem:[%s2902_s1 + $0x64] ss:$8 sps:$4 sm:$0xff]   ;;  %v2019_v4 = vld [vmem:[%s2902_s1 + $0x60] ss:$8 sps:$4 sm:$0xff]   ;;  %v2020_v5 = vld [vmem:[%s2902_s1 + $0x54] ss:$8 sps:$4 sm:$0xff]  }
   0xd   : > { %408 = vmatprep.subr.bf16.mxu0 %v2014_v0  ;;  %v2022_v6 = vld [vmem:[%s2902_s1 + $0x50] ss:$8 sps:$4 sm:$0xff]   ;;  %v2023_v7 = vld [vmem:[%s2902_s1 + $0x44] ss:$8 sps:$4 sm:$0xff]   ;;  %v2034_v8 = vld [vmem:[%s2902_s1 + $0x174] ss:$8 sps:$4 sm:$0xff]  }
   0xe   : > { %409 = vmatpush1.bf16.msra.mxu0 %v2016_v1  ;;  %s2003_s19 = sshll.u32 %s2910_s25, 3  ;;  %v2037_v9 = vld [vmem:[%s2902_s1 + $0x170] ss:$8 sps:$4 sm:$0xff]   ;;  %v2025_v10 = vld [vmem:[%s2902_s1 + $0x40] ss:$8 sps:$4 sm:$0xff]   ;;  %548 = vmatprep.subr.bf16.mxu1 %v2034_v8 }
   0xf   : > { %410 = vmatprep.subr.bf16.mxu0 %v2017_v3  ;;  %v2026_v11 = vld [vmem:[%s2902_s1 + $0x34] ss:$8 sps:$4 sm:$0xff]   ;;  %549 = vmatpush1.bf16.msra.mxu1 %v2037_v9  ;;  %v2040_v12 = vld [vmem:[%s2902_s1 + $0x164] ss:$8 sps:$4 sm:$0xff]   ;;  %s2356_s9 = scalar_lea.vmem %s2901_s0, %s2003_s19  ;;  %v2043_v13 = vld [vmem:[%s2902_s1 + $0x160] ss:$8 sps:$4 sm:$0xff]  }
  0x10   : > { %v2028_v14 = vld [vmem:[%s2902_s1 + $0x30] ss:$8 sps:$4 sm:$0xff]   ;;  %550 = vmatprep.subr.bf16.mxu1 %v2040_v12  ;;  %v2045_v15 = vld [vmem:[%s2902_s1 + $0x154] ss:$8 sps:$4 sm:$0xff]   ;;  %v2029_v16 = vld [vmem:[%s2902_s1 + $0x24] ss:$8 sps:$4 sm:$0xff]  }
  0x11   : > { %v2050_v17 = vld [vmem:[%s2902_s1 + $0x150] ss:$8 sps:$4 sm:$0xff]   ;;  %v2051_v18 = vld [vmem:[%s2902_s1 + $0x144] ss:$8 sps:$4 sm:$0xff]   ;;  %v2031_v19 = vld [vmem:[%s2902_s1 + $0x20] ss:$8 sps:$4 sm:$0xff]  }
  0x12   : > { %411 = vmatpush1.bf16.msra.mxu0 %v2019_v4  ;;  %v2032_v20 = vld [vmem:[%s2902_s1 + $0x14] ss:$8 sps:$4 sm:$0xff]   ;;  %v2056_v21 = vld [vmem:[%s2902_s1 + $0x140] ss:$8 sps:$4 sm:$0xff]   ;;  %v2036_v23 = vld [vmem:[%s2902_s1 + $0x10] ss:$8 sps:$4 sm:$0xff]  }
  0x13   : > { %412 = vmatprep.subr.bf16.mxu0 %v2020_v5  ;;  %551 = vmatpush1.bf16.msra.mxu1 %v2043_v13  ;;  %v2057_v22 = vld [vmem:[%s2902_s1 + $0x134] ss:$8 sps:$4 sm:$0xff]   ;;  %v2038_v24 = vld [vmem:[%s2902_s1 + $0x4] ss:$8 sps:$4 sm:$0xff]   ;;  %v2062_v25 = vld [vmem:[%s2902_s1 + $0x130] ss:$8 sps:$4 sm:$0xff]  }
  0x14   : > { %552 = vmatprep.subr.bf16.mxu1 %v2045_v15  ;;  %v2063_v26 = vld [vmem:[%s2902_s1 + $0x124] ss:$8 sps:$4 sm:$0xff]   ;;  %v2042_v27 = vld [vmem:[%s2902_s1] ss:$8 sps:$4 sm:$0xff]   ;;  %v2049_v28 = vld [vmem:[%s2902_s1 + $0xf4] ss:$8 sps:$4 sm:$0xff]  }
  0x15   : > { %v2068_v29 = vld [vmem:[%s2902_s1 + $0x120] ss:$8 sps:$4 sm:$0xff]   ;;  %v2069_v30 = vld [vmem:[%s2902_s1 + $0x114] ss:$8 sps:$4 sm:$0xff]   ;;  %v2047_v32 = vld [vmem:[%s2902_s1 + $0xf0] ss:$8 sps:$4 sm:$0xff]  }
  0x16   : > { %413 = vmatpush1.bf16.msra.mxu0 %v2022_v6  ;;  %v2413_v31 = vld [vmem:[%s2356_s9] sm:$0xff]   ;;  %v2074_v34 = vld [vmem:[%s2902_s1 + $0x110] ss:$8 sps:$4 sm:$0xff]   ;;  %v2061_v37 = vld [vmem:[%s2902_s1 + $0xd4] ss:$8 sps:$4 sm:$0xff]   ;;  %s2004_s19 = sshll.u32 %s2910_s25, 5 }
  0x17   : > { %414 = vmatprep.subr.bf16.mxu0 %v2023_v7  ;;  %553 = vmatpush1.bf16.msra.mxu1 %v2050_v17  ;;  %v2055_v33 = vld [vmem:[%s2902_s1 + $0xe4] ss:$8 sps:$4 sm:$0xff]   ;;  %v2053_v36 = vld [vmem:[%s2902_s1 + $0xe0] ss:$8 sps:$4 sm:$0xff]   ;;  %v2089_v39 = vld [vmem:[%s2903_s2 + $0x74] ss:$8 sps:$4 sm:$0xff]   ;;  %s278_s21 = scalar_lea.vmem %s2908_s7, %s2004_s19 }
  0x18   : > { %554 = vmatprep.subr.bf16.mxu1 %v2051_v18  ;;  %v2075_v35 = vld [vmem:[%s2902_s1 + $0x104] ss:$8 sps:$4 sm:$0xff]   ;;  %v2080_v38 = vld [vmem:[%s2902_s1 + $0x100] ss:$8 sps:$4 sm:$0xff]   ;;  %v2059_v40 = vld [vmem:[%s2902_s1 + $0xd0] ss:$8 sps:$4 sm:$0xff]  }
  0x19   : > { %v2067_v41 = vld [vmem:[%s2902_s1 + $0xc4] ss:$8 sps:$4 sm:$0xff]   ;;  %v2087_v42 = vld [vmem:[%s2903_s2 + $0x70] ss:$8 sps:$4 sm:$0xff]   ;;  %v2065_v43 = vld [vmem:[%s2902_s1 + $0xc0] ss:$8 sps:$4 sm:$0xff]  }
  0x1a   : > { %415 = vmatpush1.bf16.msra.mxu0 %v2025_v10  ;;  %v2095_v44 = vld [vmem:[%s2903_s2 + $0x64] ss:$8 sps:$4 sm:$0xff]   ;;  %v2073_v45 = vld [vmem:[%s2902_s1 + $0xb4] ss:$8 sps:$4 sm:$0xff]   ;;  %v2093_v46 = vld [vmem:[%s2903_s2 + $0x60] ss:$8 sps:$4 sm:$0xff]  }
  0x1b   : > { %416 = vmatprep.subr.bf16.mxu0 %v2026_v11  ;;  %555 = vmatpush1.bf16.msra.mxu1 %v2056_v21  ;;  %v2101_v47 = vld [vmem:[%s2903_s2 + $0x54] ss:$8 sps:$4 sm:$0xff]   ;;  %v2071_v48 = vld [vmem:[%s2902_s1 + $0xb0] ss:$8 sps:$4 sm:$0xff]   ;;  %v2079_v49 = vld [vmem:[%s2902_s1 + $0xa4] ss:$8 sps:$4 sm:$0xff]  }
  0x1c   : > { %556 = vmatprep.subr.bf16.mxu1 %v2057_v22  ;;  %v2099_v50 = vld [vmem:[%s2903_s2 + $0x50] ss:$8 sps:$4 sm:$0xff]   ;;  %v2107_v51 = vld [vmem:[%s2903_s2 + $0x44] ss:$8 sps:$4 sm:$0xff]   ;;  %v2077_v52 = vld [vmem:[%s2902_s1 + $0xa0] ss:$8 sps:$4 sm:$0xff]  }
  0x1d   : > { %v2083_v53 = vld [vmem:[%s2902_s1 + $0x94] ss:$8 sps:$4 sm:$0xff]   ;;  %v2105_v54 = vld [vmem:[%s2903_s2 + $0x40] ss:$8 sps:$4 sm:$0xff]   ;;  %v2081_v55 = vld [vmem:[%s2902_s1 + $0x90] ss:$8 sps:$4 sm:$0xff]  }
  0x1e   : > { %417 = vmatpush1.bf16.msra.mxu0 %v2028_v14  ;;  %v2086_v56 = vld [vmem:[%s2902_s1 + $0x84] ss:$8 sps:$4 sm:$0xff]   ;;  %v2084_v57 = vld [vmem:[%s2902_s1 + $0x80] ss:$8 sps:$4 sm:$0xff]   ;;  %v2092_v58 = vld [vmem:[%s2903_s2 + $0x274] ss:$8 sps:$4 sm:$0xff]  }
  0x1f   : > { %418 = vmatprep.subr.bf16.mxu0 %v2029_v16  ;;  %557 = vmatpush1.bf16.msra.mxu1 %v2062_v25  ;;  %v2090_v59 = vld [vmem:[%s2903_s2 + $0x270] ss:$8 sps:$4 sm:$0xff]   ;;  %v2098_v60 = vld [vmem:[%s2903_s2 + $0x264] ss:$8 sps:$4 sm:$0xff]   ;;  %v2096_v61 = vld [vmem:[%s2903_s2 + $0x260] ss:$8 sps:$4 sm:$0xff]  }
  0x20   : > { %558 = vmatprep.subr.bf16.mxu1 %v2063_v26  ;;  %v2104_v62 = vld [vmem:[%s2903_s2 + $0x254] ss:$8 sps:$4 sm:$0xff]   ;;  %v2102_v63 = vld [vmem:[%s2903_s2 + $0x250] ss:$8 sps:$4 sm:$0xff]   ;;  %v2110_v0 = vld [vmem:[%s2903_s2 + $0x244] ss:$8 sps:$4 sm:$0xff]  }
  0x21   : > { %v2108_v1 = vld [vmem:[%s2903_s2 + $0x240] ss:$8 sps:$4 sm:$0xff]   ;;  %v2113_v3 = vld [vmem:[%s2903_s2 + $0x34] ss:$8 sps:$4 sm:$0xff]   ;;  %v2111_v4 = vld [vmem:[%s2903_s2 + $0x30] ss:$8 sps:$4 sm:$0xff]  }
  0x22   : > { %419 = vmatpush1.bf16.msra.mxu0 %v2031_v19  ;;  %v2116_v5 = vld [vmem:[%s2903_s2 + $0x234] ss:$8 sps:$4 sm:$0xff]   ;;  %v2114_v6 = vld [vmem:[%s2903_s2 + $0x230] ss:$8 sps:$4 sm:$0xff]   ;;  %v2119_v7 = vld [vmem:[%s2903_s2 + $0x24] ss:$8 sps:$4 sm:$0xff]  }
  0x23   : > { %420 = vmatprep.subr.bf16.mxu0 %v2032_v20  ;;  %559 = vmatpush1.bf16.msra.mxu1 %v2068_v29  ;;  %v2117_v8 = vld [vmem:[%s2903_s2 + $0x20] ss:$8 sps:$4 sm:$0xff]   ;;  %v2122_v9 = vld [vmem:[%s2903_s2 + $0x224] ss:$8 sps:$4 sm:$0xff]   ;;  %v2123_v11 = vld [vmem:[%s2903_s2 + $0x10] ss:$8 sps:$4 sm:$0xff]  }
  0x24   : > { %560 = vmatprep.subr.bf16.mxu1 %v2069_v30  ;;  %v2120_v10 = vld [vmem:[%s2903_s2 + $0x220] ss:$8 sps:$4 sm:$0xff]   ;;  %v2125_v12 = vld [vmem:[%s2903_s2 + $0x14] ss:$8 sps:$4 sm:$0xff]   ;;  %v2126_v13 = vld [vmem:[%s2903_s2 + $0x210] ss:$8 sps:$4 sm:$0xff]  }
  0x25   : > { %v2128_v14 = vld [vmem:[%s2903_s2 + $0x214] ss:$8 sps:$4 sm:$0xff]   ;;  %v2131_v15 = vld [vmem:[%s2903_s2 + $0x4] ss:$8 sps:$4 sm:$0xff]   ;;  %v2129_v17 = vld [vmem:[%s2903_s2] ss:$8 sps:$4 sm:$0xff]  }
  0x26   : > { %421 = vmatpush1.bf16.msra.mxu0 %v2036_v23  ;;  %v2134_v16 = vld [vmem:[%s2903_s2 + $0x204] ss:$8 sps:$4 sm:$0xff]   ;;  %v2132_v18 = vld [vmem:[%s2903_s2 + $0x200] ss:$8 sps:$4 sm:$0xff]   ;;  %v2137_v19 = vld [vmem:[%s2903_s2 + $0xf4] ss:$8 sps:$4 sm:$0xff]  }
  0x27   : > { %422 = vmatprep.subr.bf16.mxu0 %v2038_v24  ;;  %561 = vmatpush1.bf16.msra.mxu1 %v2074_v34  ;;  %v2140_v20 = vld [vmem:[%s2903_s2 + $0x2f4] ss:$8 sps:$4 sm:$0xff]   ;;  %v2135_v21 = vld [vmem:[%s2903_s2 + $0xf0] ss:$8 sps:$4 sm:$0xff]   ;;  %v2143_v23 = vld [vmem:[%s2903_s2 + $0xe4] ss:$8 sps:$4 sm:$0xff]  }
  0x28   : > { %562 = vmatprep.subr.bf16.mxu1 %v2075_v35  ;;  %v2138_v22 = vld [vmem:[%s2903_s2 + $0x2f0] ss:$8 sps:$4 sm:$0xff]   ;;  %v2146_v24 = vld [vmem:[%s2903_s2 + $0x2e4] ss:$8 sps:$4 sm:$0xff]   ;;  %v2141_v25 = vld [vmem:[%s2903_s2 + $0xe0] ss:$8 sps:$4 sm:$0xff]  }
  0x29   : > { %v2144_v26 = vld [vmem:[%s2903_s2 + $0x2e0] ss:$8 sps:$4 sm:$0xff]   ;;  %v2147_v29 = vld [vmem:[%s2903_s2 + $0xd0] ss:$8 sps:$4 sm:$0xff]  }
  0x2a   : > { %423 = vmatpush1.bf16.msra.mxu0 %v2042_v27  ;;  %v2149_v27 = vld [vmem:[%s2903_s2 + $0xd4] ss:$8 sps:$4 sm:$0xff]   ;;  %v2150_v30 = vld [vmem:[%s2903_s2 + $0x2d0] ss:$8 sps:$4 sm:$0xff]   ;;  %v2153_v34 = vld [vmem:[%s2903_s2 + $0xc0] ss:$8 sps:$4 sm:$0xff]  }
  0x2b   : > { %684 = vmatprep.subr.bf16.mxu0 %v2049_v28  ;;  %563 = vmatpush1.bf16.msra.mxu1 %v2080_v38  ;;  %v2152_v28 = vld [vmem:[%s2903_s2 + $0x2d4] ss:$8 sps:$4 sm:$0xff]   ;;  %v2156_v35 = vld [vmem:[%s2903_s2 + $0x2c0] ss:$8 sps:$4 sm:$0xff]  }
  0x2c   : > { %991 = vmatprep.subr.bf16.mxu1 %v2089_v39  ;;  %v2164_v38 = vld [vmem:[%s2903_s2 + $0x2b4] ss:$8 sps:$4 sm:$0xff]   ;;  %v2162_v39 = vld [vmem:[%s2903_s2 + $0x2b0] ss:$8 sps:$4 sm:$0xff]  }
  0x2d   : > { %441 = vmatmul.mubr.bf16.vlgmr.msra.gmra.mxu0 %v2413_v31 }
  0x2e   : > { %685 = vmatpush1.bf16.msra.mxu0 %v2047_v32  ;;  %716 = vmatprep.mubr.bf16.mxu0 %v2263_v2  ;;  %v2155_v32 = vld [vmem:[%s2903_s2 + $0xc4] ss:$8 sps:$4 sm:$0xff]  }
  0x2f   : > { %686 = vmatprep.subr.bf16.mxu0 %v2055_v33  ;;  %581 = vmatmul.mubr.bf16.vlgmr.msra.gmra.mxu1 %v2413_v31  ;;  %v2158_v33 = vld [vmem:[%s2903_s2 + $0x2c4] ss:$8 sps:$4 sm:$0xff]  }
  0x30   : > { %992 = vmatpush1.bf16.msra.mxu1 %v2087_v42  ;;  %v2170_v42 = vld [vmem:[%s2903_s2 + $0x2a4] ss:$8 sps:$4 sm:$0xff]  }
  0x31   : > { %993 = vmatprep.subr.bf16.mxu1 %v2095_v44  ;;  %v2173_v44 = vld [vmem:[%s2903_s2 + $0x94] ss:$8 sps:$4 sm:$0xff]  }
  0x32   : > { %687 = vmatpush1.bf16.msra.mxu0 %v2053_v36  ;;  %v2161_v36 = vld [vmem:[%s2903_s2 + $0xb4] ss:$8 sps:$4 sm:$0xff]  }
  0x33   : > { %688 = vmatprep.subr.bf16.mxu0 %v2061_v37  ;;  %v2159_v37 = vld [vmem:[%s2903_s2 + $0xb0] ss:$8 sps:$4 sm:$0xff]  }
  0x34   : > { %994 = vmatpush1.bf16.msra.mxu1 %v2093_v46  ;;  %v2176_v46 = vld [vmem:[%s2903_s2 + $0x294] ss:$8 sps:$4 sm:$0xff]  }
  0x35   : > { %995 = vmatprep.subr.bf16.mxu1 %v2101_v47  ;;  %v2174_v47 = vld [vmem:[%s2903_s2 + $0x290] ss:$8 sps:$4 sm:$0xff]  }
  0x36   : > { %689 = vmatpush1.bf16.msra.mxu0 %v2059_v40  ;;  %v2167_v40 = vld [vmem:[%s2903_s2 + $0xa4] ss:$8 sps:$4 sm:$0xff]  }
  0x37   : > { %690 = vmatprep.subr.bf16.mxu0 %v2067_v41  ;;  %v2165_v41 = vld [vmem:[%s2903_s2 + $0xa0] ss:$8 sps:$4 sm:$0xff]  }
  0x38   : > { %996 = vmatpush1.bf16.msra.mxu1 %v2099_v50  ;;  %v2182_v50 = vld [vmem:[%s2903_s2 + $0x284] ss:$8 sps:$4 sm:$0xff]  }
  0x39   : > { %997 = vmatprep.subr.bf16.mxu1 %v2107_v51  ;;  %v2180_v51 = vld [vmem:[%s2903_s2 + $0x280] ss:$8 sps:$4 sm:$0xff]  }
  0x3a   : > { %691 = vmatpush1.bf16.msra.mxu0 %v2065_v43  ;;  %v2168_v43 = vld [vmem:[%s2903_s2 + $0x2a0] ss:$8 sps:$4 sm:$0xff]  }
  0x3b   : > { %692 = vmatprep.subr.bf16.mxu0 %v2073_v45  ;;  %v2171_v45 = vld [vmem:[%s2903_s2 + $0x90] ss:$8 sps:$4 sm:$0xff]  }
  0x3c   : > { %998 = vmatpush1.bf16.msra.mxu1 %v2105_v54 }
  0x3d   : > { %999 = vmatprep.subr.bf16.mxu1 %v2113_v3 }
  0x3e   : > { %693 = vmatpush1.bf16.msra.mxu0 %v2071_v48  ;;  %v2179_v48 = vld [vmem:[%s2903_s2 + $0x84] ss:$8 sps:$4 sm:$0xff]  }
  0x3f   : > { %694 = vmatprep.subr.bf16.mxu0 %v2079_v49  ;;  %v2177_v49 = vld [vmem:[%s2903_s2 + $0x80] ss:$8 sps:$4 sm:$0xff]  }
  0x40   : > { %1000 = vmatpush1.bf16.msra.mxu1 %v2111_v4 }
  0x41   : > { %1001 = vmatprep.subr.bf16.mxu1 %v2119_v7 }
  0x42   : > { %695 = vmatpush1.bf16.msra.mxu0 %v2077_v52  ;;  %v2185_v52 = vld [vmem:[%s2903_s2 + $0x174] ss:$8 sps:$4 sm:$0xff]  }
  0x43   : > { %696 = vmatprep.subr.bf16.mxu0 %v2083_v53  ;;  %v2209_v53 = vld [vmem:[%s2904_s3 + $0x74] ss:$8 sps:$4 sm:$0xff]  }
  0x44   : > { %1002 = vmatpush1.bf16.msra.mxu1 %v2117_v8 }
  0x45   : > { %1003 = vmatprep.subr.bf16.mxu1 %v2125_v12 }
  0x46   : > { %697 = vmatpush1.bf16.msra.mxu0 %v2081_v55 }
  0x47   : > { %698 = vmatprep.subr.bf16.mxu0 %v2086_v56 }
  0x48   : > { %1004 = vmatpush1.bf16.msra.mxu1 %v2123_v11 }
  0x49   : > { %1005 = vmatprep.subr.bf16.mxu1 %v2131_v15 }
  0x4a   : > { %699 = vmatpush1.bf16.msra.mxu0 %v2084_v57  ;;  %v282_v57 = vlaneseq }
  0x4b   : > { %1227 = vmatprep.subr.bf16.mxu0 %v2092_v58 }
  0x4c   : > { %1006 = vmatpush1.bf16.msra.mxu1 %v2129_v17 }
  0x4d   : > { %717 = vmatmul.mubr.bf16.vlgmr.msra.gmra.mxu0 %v2413_v31  ;;  %1007 = vmatprep.subr.bf16.mxu1 %v2137_v19 }
  0x4e   : > { %1228 = vmatpush1.bf16.msra.mxu0 %v2090_v59 }
  0x4f   : > { %1229 = vmatprep.subr.bf16.mxu0 %v2098_v60  ;;  %v2671_v60 = vshrl.u32 %v282_v57, 7  ;;  %v2221_v57 = vld [vmem:[%s2904_s3 + $0x54] ss:$8 sps:$4 sm:$0xff]  }
  0x50   : > { %1008 = vmatpush2.bf16.msra.mxu1 %v2135_v21 }
  0x51   : > { %1009 = vmatprep.subr.bf16.mxu1 %v2143_v23  ;;  %vm595_vm0 = vcmp.lt.s32.totalorder %v2671_v60, 1  ;;  %vm285_vm1 = vcmp.eq.s32.totalorder %v2671_v60, 0  ;;  %vm731_vm2 = vcmp.lt.s32.totalorder %v2671_v60, 7 }
  0x52   : > { %1230 = vmatpush1.bf16.msra.mxu0 %v2096_v61 }
  0x53   : > { %1231 = vmatprep.subr.bf16.mxu0 %v2104_v62 }
  0x54   : > { %1010 = vmatpush2.bf16.msra.mxu1 %v2141_v25 }
  0x55   : > { %1011 = vmatprep.subr.bf16.mxu1 %v2149_v27 }
  0x56   : > { %1232 = vmatpush1.bf16.msra.mxu0 %v2102_v63 }
  0x57   : > { %1233 = vmatprep.subr.bf16.mxu0 %v2110_v0 }
  0x58   : > { %1012 = vmatpush2.bf16.msra.mxu1 %v2147_v29 }
  0x59   : > { %1013 = vmatprep.subr.bf16.mxu1 %v2155_v32 }
  0x5a   : > { %1234 = vmatpush1.bf16.msra.mxu0 %v2108_v1 }
  0x5b   : > { %1235 = vmatprep.subr.bf16.mxu0 %v2116_v5 }
  0x5c   : > { %1014 = vmatpush2.bf16.msra.mxu1 %v2153_v34 }
  0x5d   : > { %1015 = vmatprep.subr.bf16.mxu1 %v2161_v36 }
  0x5e   : > { %1236 = vmatpush1.bf16.msra.mxu0 %v2114_v6 }
  0x5f   : > { %1237 = vmatprep.subr.bf16.mxu0 %v2122_v9  ;;  %v2680_v9 = vadd.s32 8, %v2671_v60 }
  0x60   : > { %1016 = vmatpush2.bf16.msra.mxu1 %v2159_v37 }
  0x61   : > { %1017 = vmatprep.subr.bf16.mxu1 %v2167_v40  ;;  %vm288_vm3 = vcmp.eq.s32.totalorder %v2680_v9, 15 }
  0x62   : > { %1238 = vmatpush1.bf16.msra.mxu0 %v2120_v10 }
  0x63   : > { %1239 = vmatprep.subr.bf16.mxu0 %v2128_v14  ;;  %v2686_v14 = vsub.s32 1, %v2671_v60 }
  0x64   : > { %1018 = vmatpush2.bf16.msra.mxu1 %v2165_v41 }
  0x65   : > { %1019 = vmatprep.subr.bf16.mxu1 %v2173_v44 }
  0x66   : > { %1240 = vmatpush1.bf16.msra.mxu0 %v2126_v13 }
  0x67   : > { %1241 = vmatprep.subr.bf16.mxu0 %v2134_v16  ;;  %v2689_v16 = vsub.s32 0, %v2671_v60 }
  0x68   : > { %1020 = vmatpush2.bf16.msra.mxu1 %v2171_v45 }
  0x69   : > { %1021 = vmatprep.subr.bf16.mxu1 %v2179_v48 }
  0x6a   : > { %1242 = vmatpush1.bf16.msra.mxu0 %v2132_v18 }
  0x6b   : > { %1243 = vmatprep.subr.bf16.mxu0 %v2140_v20  ;;  %v744_v20 = vld [vmem:[%s2905_s4] sm:$0x3] }
  0x6c   : > { %1022 = vmatpush2.bf16.msra.mxu1 %v2177_v49  ;;  %v753_v27 = vrot.slane %v744_v20, %v2686_v14  ;;  %v749_v32 = vrot.slane %v744_v20, %v2689_v16  ;;  %v2183_v49 = vld [vmem:[%s2903_s2 + $0x170] ss:$8 sps:$4 sm:$0xff]   ;;  %v2249_v20 = vld [vmem:[%s2904_s3] ss:$8 sps:$4 sm:$0xff]  }
  0x6d   : > { %1442 = vmatprep.subr.bf16.mxu1 %v2185_v52  ;;  %v2207_v52 = vld [vmem:[%s2904_s3 + $0x70] ss:$8 sps:$4 sm:$0xff]  }
  0x6e   : > { %1244 = vmatpush2.bf16.msra.mxu0 %v2138_v22 }
  0x6f   : > { %1245 = vmatprep.subr.bf16.mxu0 %v2146_v24 }
  0x72   : > { %1246 = vmatpush2.bf16.msra.mxu0 %v2144_v26 }
  0x73   : > { %1247 = vmatprep.subr.bf16.mxu0 %v2152_v28 }
  0x76   : > { %1248 = vmatpush2.bf16.msra.mxu0 %v2150_v30 }
  0x77   : > { %1249 = vmatprep.subr.bf16.mxu0 %v2158_v33 }
  0x7a   : > { %1250 = vmatpush2.bf16.msra.mxu0 %v2156_v35 }
  0x7b   : > { %1251 = vmatprep.subr.bf16.mxu0 %v2164_v38 }
  0x7e   : > { %1252 = vmatpush2.bf16.msra.mxu0 %v2162_v39 }
  0x7f   : > { %1253 = vmatprep.subr.bf16.mxu0 %v2170_v42 }
  0x82   : > { %1254 = vmatpush2.bf16.msra.mxu0 %v2168_v43 }
  0x83   : > { %1255 = vmatprep.subr.bf16.mxu0 %v2176_v46 }
  0x86   : > { %1256 = vmatpush2.bf16.msra.mxu0 %v2174_v47 }
  0x87   : > { %1257 = vmatprep.subr.bf16.mxu0 %v2182_v50 }
  0x8a   : > { %1258 = vmatpush2.bf16.msra.mxu0 %v2180_v51  ;;  %v2188_v51 = vld [vmem:[%s2903_s2 + $0x164] ss:$8 sps:$4 sm:$0xff]  }
  0x8b   : > { %1625 = vmatprep.subr.bf16.mxu0 %v2209_v53  ;;  %v2215_v53 = vld [vmem:[%s2904_s3 + $0x64] ss:$8 sps:$4 sm:$0xff]  }
  0xed   : > { %v442_v54 = vpop.f32.mrf.mxu0 }
  0xee   : > { %v591_v1 = vrot.slane %v442_v54, 7  ;;  %v2186_v54 = vld [vmem:[%s2903_s2 + $0x160] ss:$8 sps:$4 sm:$0xff]  }
  0xef   : > { %v444_v55 = vpop.f32.mrf.mxu0  ;;  %v582_v56 = vpop.f32.mrf.mxu1 }
  0xf0   : > { %v592_v3 = vrot.slane %v444_v55, 7  ;;  %v727_v6 = vrot.slane %v582_v56, 1  ;;  %v2191_v55 = vld [vmem:[%s2903_s2 + $0x154] ss:$8 sps:$4 sm:$0xff]   ;;  %v2213_v56 = vld [vmem:[%s2904_s3 + $0x60] ss:$8 sps:$4 sm:$0xff]  }
  0xf1   : > { %v446_v58 = vpop.f32.mrf.mxu0  ;;  %v584_v59 = vpop.f32.mrf.mxu1 }
  0xf2   : > { %v593_v63 = vrot.slane %v446_v58, 7  ;;  %v728_v10 = vrot.slane %v584_v59, 1  ;;  %v2189_v58 = vld [vmem:[%s2903_s2 + $0x150] ss:$8 sps:$4 sm:$0xff]   ;;  %v2194_v59 = vld [vmem:[%s2903_s2 + $0x144] ss:$8 sps:$4 sm:$0xff]  }
  0xf3   : > { %v448_v61 = vpop.f32.mrf.mxu0  ;;  %v586_v62 = vpop.f32.mrf.mxu1 }
  0xf4   : > { %v594_v0 = vrot.slane %v448_v61, 7  ;;  %v598_v5 = vsel %vm595_vm0, %v593_v63, %v591_v1  ;;  %v729_v7 = vrot.slane %v586_v62, 1  ;;  %v596_v24 = vsel %vm595_vm0, %v591_v1, %v593_v63  ;;  %v2219_v61 = vld [vmem:[%s2904_s3 + $0x50] ss:$8 sps:$4 sm:$0xff]   ;;  %v2192_v62 = vld [vmem:[%s2903_s2 + $0x140] ss:$8 sps:$4 sm:$0xff]  }
  0xf5   : > { %v588_v4 = vpop.f32.mrf.mxu1  ;;  %v600_v13 = vsel %vm285_vm1, 0.0, %v598_v5  ;;  %v2197_v63 = vld [vmem:[%s2903_s2 + $0x134] ss:$8 sps:$4 sm:$0xff]   ;;  %v2231_v5 = vld [vmem:[%s2904_s3 + $0x30] ss:$8 sps:$4 sm:$0xff]  }
  0xf6   : > { %v599_v8 = vsel %vm595_vm0, %v594_v0, %v592_v3  ;;  %v730_v11 = vrot.slane %v588_v4, 1  ;;  %v732_v19 = vsel %vm731_vm2, %v727_v6, %v729_v7  ;;  %v734_v22 = vsel %vm731_vm2, %v729_v7, %v727_v6  ;;  %v2233_v1 = vld [vmem:[%s2904_s3 + $0x34] ss:$8 sps:$4 sm:$0xff]   ;;  %v2200_v4 = vld [vmem:[%s2903_s2 + $0x124] ss:$8 sps:$4 sm:$0xff]  }
  0xf7   : > { %v601_v17 = vsel %vm285_vm1, 0.0, %v599_v8  ;;  %v738_v33 = vsel %vm288_vm3, 0.0, %v734_v22  ;;  %v597_v34 = vsel %vm595_vm0, %v592_v3, %v594_v0  ;;  %v2225_v0 = vld [vmem:[%s2904_s3 + $0x40] ss:$8 sps:$4 sm:$0xff]   ;;  %v2195_v3 = vld [vmem:[%s2903_s2 + $0x130] ss:$8 sps:$4 sm:$0xff]  }
  0xf8   : > { %v733_v23 = vsel %vm731_vm2, %v728_v10, %v730_v11  ;;  %v735_v29 = vsel %vm731_vm2, %v730_v11, %v728_v10  ;;  %v2239_v6 = vld [vmem:[%s2904_s3 + $0x24] ss:$8 sps:$4 sm:$0xff]   ;;  %v2198_v7 = vld [vmem:[%s2903_s2 + $0x120] ss:$8 sps:$4 sm:$0xff]   ;;  %v2203_v8 = vld [vmem:[%s2903_s2 + $0x114] ss:$8 sps:$4 sm:$0xff]  }
  0xf9   : > { %v739_v38 = vsel %vm288_vm3, 0.0, %v735_v29  ;;  %v2237_v10 = vld [vmem:[%s2904_s3 + $0x20] ss:$8 sps:$4 sm:$0xff]   ;;  %v2245_v11 = vld [vmem:[%s2904_s3 + $0x14] ss:$8 sps:$4 sm:$0xff]  }
  0xfa   : > { %v2218_v22 = vld [vmem:[%s2903_s2 + $0x1e4] ss:$8 sps:$4 sm:$0xff]  }
  0xfb   : > { %v2242_v29 = vld [vmem:[%s2903_s2 + $0x1a4] ss:$8 sps:$4 sm:$0xff]  }
 0x10d   : > { %v718_v12 = vpop.f32.mrf.mxu0 }
 0x10e   : > { %v719_v15 = vadd.f32 %v718_v12, %v600_v13  ;;  %v2201_v12 = vld [vmem:[%s2903_s2 + $0x110] ss:$8 sps:$4 sm:$0xff]   ;;  %v2206_v13 = vld [vmem:[%s2903_s2 + $0x104] ss:$8 sps:$4 sm:$0xff]  }
 0x10f   : > { %v720_v18 = vpop.f32.mrf.mxu0 }
 0x110   : > { %v721_v21 = vadd.f32 %v720_v18, %v601_v17  ;;  %v740_v30 = vadd.f32 %v732_v19, %v719_v15  ;;  %v2243_v15 = vld [vmem:[%s2904_s3 + $0x10] ss:$8 sps:$4 sm:$0xff]   ;;  %v2251_v17 = vld [vmem:[%s2904_s3 + $0x4] ss:$8 sps:$4 sm:$0xff]   ;;  %v2204_v18 = vld [vmem:[%s2903_s2 + $0x100] ss:$8 sps:$4 sm:$0xff]  }
 0x111   : > { %v722_v25 = vpop.f32.mrf.mxu0  ;;  %v2212_v19 = vld [vmem:[%s2903_s2 + $0x1f4] ss:$8 sps:$4 sm:$0xff]  }
 0x112   : > { %v741_v26 = vadd.f32 %v733_v23, %v721_v21  ;;  %v723_v28 = vadd.f32 %v722_v25, %v596_v24  ;;  %v756_v42 = vadd.f32 %v749_v32, %v740_v30  ;;  %v2210_v21 = vld [vmem:[%s2903_s2 + $0x1f0] ss:$8 sps:$4 sm:$0xff]   ;;  %v2216_v23 = vld [vmem:[%s2903_s2 + $0x1e0] ss:$8 sps:$4 sm:$0xff]   ;;  %v2224_v24 = vld [vmem:[%s2903_s2 + $0x1d4] ss:$8 sps:$4 sm:$0xff]  }
 0x113   : > { %v724_v35 = vpop.f32.mrf.mxu0  ;;  %v2222_v25 = vld [vmem:[%s2903_s2 + $0x1d0] ss:$8 sps:$4 sm:$0xff]   ;;  %v2240_v30 = vld [vmem:[%s2903_s2 + $0x1a0] ss:$8 sps:$4 sm:$0xff]  }
 0x114   : > { %v742_v36 = vadd.f32 %v738_v33, %v723_v28  ;;  %v725_v37 = vadd.f32 %v724_v35, %v597_v34  ;;  %v757_v39 = vadd.f32 %v753_v27, %v741_v26  ;;  %v760_v47 = vmax.f32 %v756_v42, 0.0  ;;  %v2230_v26 = vld [vmem:[%s2903_s2 + $0x1c4] ss:$8 sps:$4 sm:$0xff]   ;;  %v2234_v28 = vld [vmem:[%s2903_s2 + $0x1b0] ss:$8 sps:$4 sm:$0xff]  }
 0x115   : > { %v2246_v33 = vld [vmem:[%s2903_s2 + $0x190] ss:$8 sps:$4 sm:$0xff]   ;;  %v2254_v34 = vld [vmem:[%s2903_s2 + $0x184] ss:$8 sps:$4 sm:$0xff]   ;;  %v2252_v35 = vld [vmem:[%s2903_s2 + $0x180] ss:$8 sps:$4 sm:$0xff]  }
 0x116   : > { %v758_v40 = vadd.f32 %v749_v32, %v742_v36  ;;  %v743_v41 = vadd.f32 %v739_v38, %v725_v37  ;;  %v761_v45 = vmax.f32 %v757_v39, 0.0  ;;  %v2248_v32 = vld [vmem:[%s2903_s2 + $0x194] ss:$8 sps:$4 sm:$0xff]  }
 0x118   : > { %v759_v43 = vadd.f32 %v753_v27, %v743_v41  ;;  %v762_v44 = vmax.f32 %v758_v40, 0.0  ;;  %v2236_v27 = vld [vmem:[%s2903_s2 + $0x1b4] ss:$8 sps:$4 sm:$0xff]  }
 0x11a   : > { %v763_v46 = vmax.f32 %v759_v43, 0.0  ;;  %v2718_v50 = vpack.c.bf16 %v762_v44, %v760_v47  ;;  %v1533_v47 = vld [vmem:[%s2907_s6] sm:$0x3] }
 0x11c   : > { %v765_v48 = vpack.c.bf16 %v763_v46, %v761_v45 }
 0x11e   : > { %1023 = vmatprep.mubr.bf16.mxu1 %v765_v48  ;;  %1259 = vmatprep.mubr.bf16.mxu0 %v765_v48 }
 0x11f   : > { %1024 = vmatmul.mubr.bf16.vlgmr.msra.gmra.mxu1 %v2718_v50  ;;  %1260 = vmatmul.mubr.bf16.vlgmr.msra.gmra.mxu0 %v2718_v50 }
 0x120   : > { %1443 = vmatpush1.bf16.msra.mxu1 %v2183_v49  ;;  %1474 = vmatprep.mubr.bf16.mxu1 %v765_v48 }
 0x121   : > { %1444 = vmatprep.subr.bf16.mxu1 %v2188_v51  ;;  %1626 = vmatpush1.bf16.msra.mxu0 %v2207_v52  ;;  %v1501_v52 = vld [vmem:[%s2906_s5] sm:$0x3] }
 0x122   : > { %1627 = vmatprep.subr.bf16.mxu0 %v2215_v53  ;;  %1657 = vmatprep.mubr.bf16.mxu0 %v2263_v2  ;;  %v2227_v2 = vld [vmem:[%s2904_s3 + $0x44] ss:$8 sps:$4 sm:$0xff]   ;;  %v1538_v53 = vrot.slane %v1533_v47, %v2689_v16 }
 0x124   : > { %1445 = vmatpush1.bf16.msra.mxu1 %v2186_v54 }
 0x125   : > { %1446 = vmatprep.subr.bf16.mxu1 %v2191_v55  ;;  %1628 = vmatpush1.bf16.msra.mxu0 %v2213_v56 }
 0x126   : > { %1629 = vmatprep.subr.bf16.mxu0 %v2221_v57 }
 0x128   : > { %1447 = vmatpush1.bf16.msra.mxu1 %v2189_v58 }
 0x129   : > { %1448 = vmatprep.subr.bf16.mxu1 %v2194_v59  ;;  %1630 = vmatpush1.bf16.msra.mxu0 %v2219_v61 }
 0x12a   : > { %1631 = vmatprep.subr.bf16.mxu0 %v2227_v2  ;;  %v1506_v2 = vrot.slane %v1501_v52, %v2689_v16 }
 0x12c   : > { %1449 = vmatpush1.bf16.msra.mxu1 %v2192_v62  ;;  %v1542_v62 = vrot.slane %v1533_v47, %v2686_v14 }
 0x12d   : > { %1450 = vmatprep.subr.bf16.mxu1 %v2197_v63  ;;  %1632 = vmatpush1.bf16.msra.mxu0 %v2225_v0 }
 0x12e   : > { %1633 = vmatprep.subr.bf16.mxu0 %v2233_v1 }
 0x130   : > { %1451 = vmatpush1.bf16.msra.mxu1 %v2195_v3 }
 0x131   : > { %1452 = vmatprep.subr.bf16.mxu1 %v2200_v4  ;;  %1634 = vmatpush1.bf16.msra.mxu0 %v2231_v5  ;;  %v1510_v4 = vrot.slane %v1501_v52, %v2686_v14 }
 0x132   : > { %1635 = vmatprep.subr.bf16.mxu0 %v2239_v6 }
 0x134   : > { %1453 = vmatpush1.bf16.msra.mxu1 %v2198_v7 }
 0x135   : > { %1454 = vmatprep.subr.bf16.mxu1 %v2203_v8  ;;  %1636 = vmatpush1.bf16.msra.mxu0 %v2237_v10 }
 0x136   : > { %1637 = vmatprep.subr.bf16.mxu0 %v2245_v11 }
 0x138   : > { %1455 = vmatpush1.bf16.msra.mxu1 %v2201_v12 }
 0x139   : > { %1456 = vmatprep.subr.bf16.mxu1 %v2206_v13  ;;  %1638 = vmatpush1.bf16.msra.mxu0 %v2243_v15 }
 0x13a   : > { %1639 = vmatprep.subr.bf16.mxu0 %v2251_v17 }
 0x13c   : > { %1457 = vmatpush1.bf16.msra.mxu1 %v2204_v18 }
 0x13d   : > { %1458 = vmatprep.subr.bf16.mxu1 %v2212_v19  ;;  %1640 = vmatpush1.bf16.msra.mxu0 %v2249_v20 }
 0x140   : > { %1459 = vmatpush2.bf16.msra.mxu1 %v2210_v21  ;;  %1658 = vmatmul.mubr.bf16.vlgmr.msra.gmra.mxu0 %v2413_v31  ;;  %v2228_v31 = vld [vmem:[%s2903_s2 + $0x1c0] ss:$8 sps:$4 sm:$0xff]  }
 0x141   : > { %1460 = vmatprep.subr.bf16.mxu1 %v2218_v22 }
 0x144   : > { %1461 = vmatpush2.bf16.msra.mxu1 %v2216_v23 }
 0x145   : > { %1462 = vmatprep.subr.bf16.mxu1 %v2224_v24 }
 0x148   : > { %1463 = vmatpush2.bf16.msra.mxu1 %v2222_v25 }
 0x149   : > { %1464 = vmatprep.subr.bf16.mxu1 %v2230_v26 }
 0x14c   : > { %1465 = vmatpush2.bf16.msra.mxu1 %v2228_v31 }
 0x14d   : > { %1466 = vmatprep.subr.bf16.mxu1 %v2236_v27 }
 0x150   : > { %1467 = vmatpush2.bf16.msra.mxu1 %v2234_v28 }
 0x151   : > { %1468 = vmatprep.subr.bf16.mxu1 %v2242_v29 }
 0x154   : > { %1469 = vmatpush2.bf16.msra.mxu1 %v2240_v30 }
 0x155   : > { %1470 = vmatprep.subr.bf16.mxu1 %v2248_v32 }
 0x158   : > { %1471 = vmatpush2.bf16.msra.mxu1 %v2246_v33 }
 0x159   : > { %1472 = vmatprep.subr.bf16.mxu1 %v2254_v34 }
 0x15c   : > { %1473 = vmatpush2.bf16.msra.mxu1 %v2252_v35 }
 0x15f   : > { %1475 = vmatmul.mubr.bf16.vlgmr.msra.gmra.mxu1 %v2718_v50 }
 0x1df   : > { %v1025_v36 = vpop.f32.mrf.mxu1  ;;  %v1261_v37 = vpop.f32.mrf.mxu0 }
 0x1e0   : > { %v1270_v45 = vrot.slane %v1025_v36, 7  ;;  %v1485_v55 = vrot.slane %v1261_v37, 1 }
 0x1e1   : > { %v1027_v38 = vpop.f32.mrf.mxu1  ;;  %v1263_v39 = vpop.f32.mrf.mxu0 }
 0x1e2   : > { %v1271_v49 = vrot.slane %v1027_v38, 7  ;;  %v1486_v63 = vrot.slane %v1263_v39, 1 }
 0x1e3   : > { %v1029_v40 = vpop.f32.mrf.mxu1  ;;  %v1265_v41 = vpop.f32.mrf.mxu0 }
 0x1e4   : > { %v1272_v43 = vrot.slane %v1029_v40, 7  ;;  %v1487_v51 = vrot.slane %v1265_v41, 1 }
 0x1e5   : > { %v1031_v42 = vpop.f32.mrf.mxu1  ;;  %v1267_v44 = vpop.f32.mrf.mxu0 }
 0x1e6   : > { %v1273_v46 = vrot.slane %v1031_v42, 7  ;;  %v1276_v50 = vsel %vm595_vm0, %v1272_v43, %v1270_v45  ;;  %v1488_v56 = vrot.slane %v1267_v44, 1  ;;  %v1489_v0 = vsel %vm731_vm2, %v1485_v55, %v1487_v51 }
 0x1e7   : > { %v1278_v57 = vsel %vm285_vm1, 0.0, %v1276_v50  ;;  %v1491_v8 = vsel %vm731_vm2, %v1487_v51, %v1485_v55  ;;  %v1274_v11 = vsel %vm595_vm0, %v1270_v45, %v1272_v43 }
 0x1e8   : > { %v1277_v54 = vsel %vm595_vm0, %v1273_v46, %v1271_v49  ;;  %v1490_v16 = vsel %vm731_vm2, %v1486_v63, %v1488_v56  ;;  %v1492_v14 = vsel %vm731_vm2, %v1488_v56, %v1486_v63  ;;  %v1495_v19 = vsel %vm288_vm3, 0.0, %v1491_v8 }
 0x1e9   : > { %v1279_v1 = vsel %vm285_vm1, 0.0, %v1277_v54  ;;  %v1275_v20 = vsel %vm595_vm0, %v1271_v49, %v1273_v46  ;;  %v1496_v27 = vsel %vm288_vm3, 0.0, %v1492_v14 }
 0x200   : > { %v1659_v48 = vpop.f32.mrf.mxu0 }
 0x201   : > { %v1660_v5 = vadd.f32 %v1659_v48, %v1538_v53 }
 0x202   : > { %v1661_v59 = vpop.f32.mrf.mxu0 }
 0x203   : > { %v1662_v18 = vadd.f32 %v1661_v59, %v1542_v62 }
 0x204   : > { %v1663_v10 = vpop.f32.mrf.mxu0 }
 0x205   : > { %v1664_v26 = vadd.f32 %v1663_v10, %v1538_v53 }
 0x206   : > { %v1665_v31 = vpop.f32.mrf.mxu0 }
 0x207   : > { %v1666_v34 = vadd.f32 %v1665_v31, %v1542_v62 }
 0x21f   : > { %v1476_v58 = vpop.f32.mrf.mxu1 }
 0x220   : > { %v1477_v61 = vadd.f32 %v1476_v58, %v1278_v57 }
 0x221   : > { %v1478_v3 = vpop.f32.mrf.mxu1 }
 0x222   : > { %v1497_v6 = vadd.f32 %v1489_v0, %v1477_v61  ;;  %v1479_v7 = vadd.f32 %v1478_v3, %v1279_v1 }
 0x223   : > { %v1480_v12 = vpop.f32.mrf.mxu1 }
 0x224   : > { %v1513_v13 = vadd.f32 %v1506_v2, %v1497_v6  ;;  %v1498_v15 = vadd.f32 %v1490_v16, %v1479_v7  ;;  %v1481_v17 = vadd.f32 %v1480_v12, %v1274_v11 }
 0x225   : > { %v1482_v21 = vpop.f32.mrf.mxu1 }
 0x226   : > { %v1668_v22 = vadd.f32 %v1660_v5, %v1513_v13  ;;  %v1514_v23 = vadd.f32 %v1510_v4, %v1498_v15  ;;  %v1499_v24 = vadd.f32 %v1495_v19, %v1481_v17  ;;  %v1483_v25 = vadd.f32 %v1482_v21, %v1275_v20 }
 0x228   : > { %v1672_v28 = vmax.f32 %v1668_v22, 0.0  ;;  %v1669_v29 = vadd.f32 %v1662_v18, %v1514_v23  ;;  %v1515_v30 = vadd.f32 %v1506_v2, %v1499_v24  ;;  %v1500_v32 = vadd.f32 %v1496_v27, %v1483_v25 }
 0x22a   : > { %1676 = vst [vmem:[%s278_s21] sm:$0xff] %v1672_v28  ;;  %v1673_v60 = vmax.f32 %v1669_v29, 0.0  ;;  %v1670_v33 = vadd.f32 %v1664_v26, %v1515_v30  ;;  %v1516_v35 = vadd.f32 %v1510_v4, %v1500_v32 }
 0x22c   : > { %1677 = vst [vmem:[%s278_s21 + $0x8] sm:$0xff] %v1673_v60  ;;  %v1674_v36 = vmax.f32 %v1670_v33, 0.0  ;;  %v1671_v37 = vadd.f32 %v1666_v34, %v1516_v35 }
 0x22e   : > { %1678 = vst [vmem:[%s278_s21 + $0x10] sm:$0xff] %v1674_v36  ;;  %v1675_v38 = vmax.f32 %v1671_v37, 0.0 }
 0x230   : > { %1679 = vst [vmem:[%s278_s21 + $0x18] sm:$0xff] %v1675_v38 }
 0x231 PF: > { %s17_s24 = sadd.s32 1, %s2261_s24  }
 0x232   : > { %p14_p4 = scmp.ge.s32.totalorder %s17_s24, 4  }
 0x234   :  { %16 = sbr.rel (!%p14_p4) target bundleno = 1 (0x1), region = 82 }

</bundles_post_ra>
